<compile_context>
chip_gen: v7x
topology: tpu7x:2x2x1
jax: 0.10.0
libtpu: 0.0.40
codegen_flags: <defaults>
</compile_context>

<pallas_src>
import functools
import math

import jax
import jax.numpy as jnp
from jax import lax
from jax.experimental import pallas as pl
from jax.experimental.pallas import tpu as pltpu


# ---------------------------------------------------------------------------
# Fused transformer-block kernel (one batch sequence per grid step)
# ---------------------------------------------------------------------------
def _fused_block_kernel(x_ref, mask_ref, g1_ref, g2_ref,
                        wq_ref, wk_ref, wv_ref, wo_ref, w1_ref, w2_ref,
                        o_ref, *, num_heads, head_dim, hidden, eps):
    f32, bf16 = jnp.float32, jnp.bfloat16
    scale = 1.0 / math.sqrt(head_dim)

    x = x_ref[0].astype(f32)                                      # [L, H]

    # --- RMSNorm 1 ---
    ms = jnp.sum(x * x, axis=-1, keepdims=True) * (1.0 / hidden)
    xn = (x * lax.rsqrt(ms + eps) * g1_ref[...].astype(f32)).astype(bf16)

    mask = mask_ref[...]                                          # [L, L], f32
    # NOTE: mask must be finite (e.g. -1e9), not -inf, so fully-masked rows
    # do not produce NaNs after the max-subtraction.

    # --- Attention + output projection (heads unrolled; num_heads is small) ---
    attn = jnp.zeros(x.shape, f32)                                # [L, H]
    for h in range(num_heads):
        q = jnp.dot(xn, wq_ref[h], preferred_element_type=f32)    # [L, hd]
        k = jnp.dot(xn, wk_ref[h], preferred_element_type=f32)
        v = jnp.dot(xn, wv_ref[h], preferred_element_type=f32)
        s = lax.dot_general(q.astype(bf16), k.astype(bf16),
                            (((1,), (1,)), ((), ())),
                            preferred_element_type=f32) * scale   # [L, L]
        s = s + mask
        s = s - jnp.max(s, axis=-1, keepdims=True)
        p = jnp.exp(s)
        p = p * pl.reciprocal(jnp.sum(p, axis=-1, keepdims=True))
        # TODO(synk): attention-prob dropout is identity (eval mode only).
        o = jnp.dot(p.astype(bf16), v.astype(bf16),
                    preferred_element_type=f32)                   # [L, hd]
        attn = attn + jnp.dot(o.astype(bf16), wo_ref[h],
                              preferred_element_type=f32)         # [L, H]

    h1 = x + attn                                                 # residual 1

    # --- RMSNorm 2 + MLP (SiLU) + residual 2 ---
    ms2 = jnp.sum(h1 * h1, axis=-1, keepdims=True) * (1.0 / hidden)
    xn2 = (h1 * lax.rsqrt(ms2 + eps) * g2_ref[...].astype(f32)).astype(bf16)
    hm = jnp.dot(xn2, w1_ref[...], preferred_element_type=f32)    # [L, 4H]
    hm = hm * jax.nn.sigmoid(hm)                                  # SiLU in f32
    mlp = jnp.dot(hm.astype(bf16), w2_ref[...],
                  preferred_element_type=f32)                     # [L, H]
    # TODO(synk): MLP dropout is identity (eval mode only).
    o_ref[0] = (h1 + mlp).astype(o_ref.dtype)


# ---------------------------------------------------------------------------
# One-time parameter preparation (hoisted out of the per-call jitted path)
# ---------------------------------------------------------------------------
def prepare_params(params, *, num_heads, head_dim):
    """Re-layout + cast weights ONCE (not per forward call)."""
    bf16 = jnp.bfloat16
    h = params["g1"].shape[0]

    def split_in(w):   # [H, NH*hd] -> [NH, H, hd]
        return jnp.transpose(w.reshape(h, num_heads, head_dim),
                             (1, 0, 2)).astype(bf16)

    return dict(
        g1=params["g1"].reshape(1, h).astype(jnp.float32),
        g2=params["g2"].reshape(1, h).astype(jnp.float32),
        wq_h=split_in(params["wq"]),
        wk_h=split_in(params["wk"]),
        wv_h=split_in(params["wv"]),
        wo_h=params["wo"].reshape(num_heads, head_dim, h).astype(bf16),
        w1=params["w1"].astype(bf16),
        w2=params["w2"].astype(bf16),
    )


# ---------------------------------------------------------------------------
# Full transformer block wrapper
# ---------------------------------------------------------------------------
def transformer_block(x, prepared, mask=None, *, num_heads, head_dim, eps=1e-5):
    """x: [B, L, H] f32; additive mask: [L, L] (finite -1e9 style) or None."""
    B, L, H = x.shape
    Dh = num_heads * head_dim
    H4 = prepared["w1"].shape[1]

    if mask is None:
        mask = jnp.zeros((L, L), jnp.float32)
    mask = mask.astype(jnp.float32)

    kernel = functools.partial(_fused_block_kernel, num_heads=num_heads,
                               head_dim=head_dim, hidden=H, eps=eps)

    flops_per_batch = (2 * L * H * 3 * Dh                 # QKV projections
                       + num_heads * 4 * L * L * head_dim  # QK^T + PV
                       + 2 * L * Dh * H                   # output projection
                       + 4 * L * H * H4)                  # MLP
    weight_bytes = 2 * (prepared["wq_h"].size + prepared["wk_h"].size
                        + prepared["wv_h"].size + prepared["wo_h"].size
                        + prepared["w1"].size + prepared["w2"].size)

    return pl.pallas_call(
        kernel,
        out_shape=jax.ShapeDtypeStruct((B, L, H), x.dtype),
        grid_spec=pltpu.PrefetchScalarGridSpec(
            num_scalar_prefetch=0,
            grid=(B,),
            in_specs=[
                pl.BlockSpec((1, L, H), lambda b: (b, 0, 0)),          # x
                pl.BlockSpec((L, L), lambda b: (0, 0)),                # mask
                pl.BlockSpec((1, H), lambda b: (0, 0)),                # g1
                pl.BlockSpec((1, H), lambda b: (0, 0)),                # g2
                pl.BlockSpec((num_heads, H, head_dim), lambda b: (0, 0, 0)),
                pl.BlockSpec((num_heads, H, head_dim), lambda b: (0, 0, 0)),
                pl.BlockSpec((num_heads, H, head_dim), lambda b: (0, 0, 0)),
                pl.BlockSpec((num_heads, head_dim, H), lambda b: (0, 0, 0)),
                pl.BlockSpec((H, H4), lambda b: (0, 0)),               # w1
                pl.BlockSpec((H4, H), lambda b: (0, 0)),               # w2
            ],
            out_specs=pl.BlockSpec((1, L, H), lambda b: (b, 0, 0)),
        ),
        compiler_params=pltpu.CompilerParams(
            dimension_semantics=("parallel",)),
        cost_estimate=pl.CostEstimate(
            flops=B * flops_per_batch,
            transcendentals=B * (num_heads * L * L + L * H4 + 2 * L),
            bytes_accessed=2 * x.size * 4 + weight_bytes + mask.size * 4),
    )(x, mask, prepared["g1"], prepared["g2"],
      prepared["wq_h"], prepared["wk_h"], prepared["wv_h"], prepared["wo_h"],
      prepared["w1"], prepared["w2"])


# ---------------------------------------------------------------------------
# Parameter init (nn.Linear kaiming-uniform bound 1/sqrt(fan_in), RMSNorm = 1)
# ---------------------------------------------------------------------------
def init_params(key, hidden_dim, num_heads, head_dim):
    h, dh = hidden_dim, num_heads * head_dim
    ks = jax.random.split(key, 6)

    def lin(k, fan_in, fan_out):
        b = 1.0 / math.sqrt(fan_in)
        return jax.random.uniform(k, (fan_in, fan_out), jnp.float32, -b, b)

    return dict(
        g1=jnp.ones((h,), jnp.float32),
        g2=jnp.ones((h,), jnp.float32),
        wq=lin(ks[0], h, dh), wk=lin(ks[1], h, dh), wv=lin(ks[2], h, dh),
        wo=lin(ks[3], dh, h),
        w1=lin(ks[4], h, 4 * h), w2=lin(ks[5], 4 * h, h),
    )


# ---------------------------------------------------------------------------
# Pure-JAX reference with matched bf16-matmul / f32-accumulate precision.
# ---------------------------------------------------------------------------
def reference_block(x, params, mask, *, num_heads, head_dim, eps=1e-5):
    B, L, H = x.shape
    bf16 = jnp.bfloat16

    def rms(v, g):
        v = v.astype(jnp.float32)
        ms = jnp.mean(v * v, axis=-1, keepdims=True)
        return v * lax.rsqrt(ms + eps) * g

    def bdot(a, b):
        return jnp.dot(a.astype(bf16), b.astype(bf16),
                       preferred_element_type=jnp.float32)

    xn = rms(x, params["g1"]).reshape(B * L, H)

    def heads(w):
        return bdot(xn, w).reshape(B, L, num_heads, head_dim).transpose(0, 2, 1, 3)

    q, k, v = heads(params["wq"]), heads(params["wk"]), heads(params["wv"])

    scale = 1.0 / math.sqrt(head_dim)
    s = jnp.einsum("bhld,bhmd->bhlm", q.astype(bf16), k.astype(bf16),
                   preferred_element_type=jnp.float32) * scale
    s = s + mask
    s = s - jnp.max(s, axis=-1, keepdims=True)
    p = jnp.exp(s)
    p = p / jnp.sum(p, axis=-1, keepdims=True)
    o = jnp.einsum("bhlm,bhmd->bhld", p.astype(bf16), v.astype(bf16),
                   preferred_element_type=jnp.float32)
    o = o.transpose(0, 2, 1, 3).reshape(B * L, num_heads * head_dim)
    h1 = x.reshape(B * L, H) + bdot(o, params["wo"])

    xn2 = rms(h1, params["g2"])
    hm = bdot(xn2, params["w1"])
    hm = hm * jax.nn.sigmoid(hm)
    out = h1 + bdot(hm, params["w2"])
    return out.reshape(B, L, H)


if __name__ == "__main__":
    key = jax.random.PRNGKey(0)
    kx, kp = jax.random.split(key)

    # Shapes consistent with the module: decoder_audio_hidden_dim = 32,
    # 4 heads x head_dim 8, batch 2, depth/sequence length 8.
    B, L, H = 2, 8, 32
    num_heads, head_dim = 4, 8
    eps = 1e-5

    x = jax.random.normal(kx, (B, L, H), jnp.float32)
    params = init_params(kp, H, num_heads, head_dim)

    # Causal additive mask (finite large-negative for masked positions).
    causal = jnp.where(jnp.tril(jnp.ones((L, L), dtype=bool)),
                       0.0, -1e9).astype(jnp.float32)

    # Weight layout / casting hoisted out of the per-call path (done once).
    prepared = prepare_params(params, num_heads=num_heads, head_dim=head_dim)

    fwd = jax.jit(functools.partial(transformer_block, num_heads=num_heads,
                                    head_dim=head_dim, eps=eps))
    out = fwd(x, prepared, causal)
    jax.block_until_ready(out)

    ref = reference_block(x, params, causal, num_heads=num_heads,
                          head_dim=head_dim, eps=eps)

    assert out.shape == (B, L, H)
    max_err = jnp.max(jnp.abs(out - ref))
    assert jnp.allclose(out, ref, atol=2e-3, rtol=2e-3), f"max err {max_err}"

    print("KERNEL_OK")
</pallas_src>

<mosaic_0001>
module attributes {stable_mosaic.version = 11 : i64} {
  func.func @_fused_block_kernel(%arg0: i32, %arg1: memref<1x8x32xf32, #tpu.memory_space<vmem>>, %arg2: memref<8x8xf32, #tpu.memory_space<vmem>>, %arg3: memref<1x32xf32, #tpu.memory_space<vmem>>, %arg4: memref<1x32xf32, #tpu.memory_space<vmem>>, %arg5: memref<4x32x8xbf16, #tpu.memory_space<vmem>>, %arg6: memref<4x32x8xbf16, #tpu.memory_space<vmem>>, %arg7: memref<4x32x8xbf16, #tpu.memory_space<vmem>>, %arg8: memref<4x8x32xbf16, #tpu.memory_space<vmem>>, %arg9: memref<32x128xbf16, #tpu.memory_space<vmem>>, %arg10: memref<128x32xbf16, #tpu.memory_space<vmem>>, %arg11: memref<1x8x32xf32, #tpu.memory_space<vmem>>) attributes {dimension_semantics = [#tpu.dimension_semantics<parallel>], iteration_bounds = array<i64: 2>, scalar_prefetch = 0 : i64, scratch_operands = 0 : i64, tpu.core_type = #tpu.core_type<tc>, window_params = [{transform_indices = @transform_0, window_bounds = array<i64: 1, 8, 32>}, {pipeline_mode = #tpu.pipeline_mode<synchronous>, transform_indices = @transform_1, window_bounds = array<i64: 8, 8>}, {pipeline_mode = #tpu.pipeline_mode<synchronous>, transform_indices = @transform_2, window_bounds = array<i64: 1, 32>}, {pipeline_mode = #tpu.pipeline_mode<synchronous>, transform_indices = @transform_3, window_bounds = array<i64: 1, 32>}, {pipeline_mode = #tpu.pipeline_mode<synchronous>, transform_indices = @transform_4, window_bounds = array<i64: 4, 32, 8>}, {pipeline_mode = #tpu.pipeline_mode<synchronous>, transform_indices = @transform_5, window_bounds = array<i64: 4, 32, 8>}, {pipeline_mode = #tpu.pipeline_mode<synchronous>, transform_indices = @transform_6, window_bounds = array<i64: 4, 32, 8>}, {pipeline_mode = #tpu.pipeline_mode<synchronous>, transform_indices = @transform_7, window_bounds = array<i64: 4, 8, 32>}, {pipeline_mode = #tpu.pipeline_mode<synchronous>, transform_indices = @transform_8, window_bounds = array<i64: 32, 128>}, {pipeline_mode = #tpu.pipeline_mode<synchronous>, transform_indices = @transform_9, window_bounds = array<i64: 128, 32>}, {transform_indices = @transform_10, window_bounds = array<i64: 1, 8, 32>}]} {
    %c0 = arith.constant 0 : index
    %c0_0 = arith.constant 0 : index
    %c0_1 = arith.constant 0 : index
    %0 = vector.load %arg1[%c0, %c0_0, %c0_1] : memref<1x8x32xf32, #tpu.memory_space<vmem>>, vector<1x8x32xf32>
    %1 = vector.shape_cast %0 : vector<1x8x32xf32> to vector<8x32xf32>
    %2 = arith.mulf %1, %1 : vector<8x32xf32>
    %cst = arith.constant dense<0.000000e+00> : vector<8xf32>
    %3 = vector.multi_reduction <add>, %2, %cst [1] : vector<8x32xf32> to vector<8xf32>
    %4 = vector.shape_cast %3 : vector<8xf32> to vector<8x1xf32>
    %cst_2 = arith.constant 3.125000e-02 : f32
    %5 = vector.broadcast %cst_2 : f32 to vector<8x1xf32>
    %6 = arith.mulf %4, %5 : vector<8x1xf32>
    %cst_3 = arith.constant 9.99999974E-6 : f32
    %7 = vector.broadcast %cst_3 : f32 to vector<8x1xf32>
    %8 = arith.addf %6, %7 : vector<8x1xf32>
    %9 = math.rsqrt %8 : vector<8x1xf32>
    %10 = vector.broadcast %9 : vector<8x1xf32> to vector<8x32xf32>
    %11 = arith.mulf %1, %10 : vector<8x32xf32>
    %c0_4 = arith.constant 0 : index
    %c0_5 = arith.constant 0 : index
    %12 = vector.load %arg3[%c0_4, %c0_5] : memref<1x32xf32, #tpu.memory_space<vmem>>, vector<1x32xf32>
    %13 = vector.broadcast %12 : vector<1x32xf32> to vector<8x32xf32>
    %14 = arith.mulf %11, %13 : vector<8x32xf32>
    %15 = arith.truncf %14 : vector<8x32xf32> to vector<8x32xbf16>
    %c0_6 = arith.constant 0 : index
    %c0_7 = arith.constant 0 : index
    %16 = vector.load %arg2[%c0_6, %c0_7] : memref<8x8xf32, #tpu.memory_space<vmem>>, vector<8x8xf32>
    %cst_8 = arith.constant 0.000000e+00 : f32
    %17 = vector.broadcast %cst_8 : f32 to vector<8x32xf32>
    %c0_9 = arith.constant 0 : index
    %c0_10 = arith.constant 0 : index
    %c0_11 = arith.constant 0 : index
    %18 = vector.load %arg5[%c0_9, %c0_10, %c0_11] : memref<4x32x8xbf16, #tpu.memory_space<vmem>>, vector<1x32x8xbf16>
    %19 = vector.shape_cast %18 : vector<1x32x8xbf16> to vector<32x8xbf16>
    %cst_12 = arith.constant dense<0.000000e+00> : vector<8x8xf32>
    %20 = tpu.matmul %15, %19, %cst_12 {dimension_numbers = #tpu.dot_dimension_numbers<[1], [0], [0], [1], [0, 0, 1, 1], [], []>} : vector<8x32xbf16>, vector<32x8xbf16>, vector<8x8xf32> -> vector<8x8xf32>
    %c0_13 = arith.constant 0 : index
    %c0_14 = arith.constant 0 : index
    %c0_15 = arith.constant 0 : index
    %21 = vector.load %arg6[%c0_13, %c0_14, %c0_15] : memref<4x32x8xbf16, #tpu.memory_space<vmem>>, vector<1x32x8xbf16>
    %22 = vector.shape_cast %21 : vector<1x32x8xbf16> to vector<32x8xbf16>
    %cst_16 = arith.constant dense<0.000000e+00> : vector<8x8xf32>
    %23 = tpu.matmul %15, %22, %cst_16 {dimension_numbers = #tpu.dot_dimension_numbers<[1], [0], [0], [1], [0, 0, 1, 1], [], []>} : vector<8x32xbf16>, vector<32x8xbf16>, vector<8x8xf32> -> vector<8x8xf32>
    %c0_17 = arith.constant 0 : index
    %c0_18 = arith.constant 0 : index
    %c0_19 = arith.constant 0 : index
    %24 = vector.load %arg7[%c0_17, %c0_18, %c0_19] : memref<4x32x8xbf16, #tpu.memory_space<vmem>>, vector<1x32x8xbf16>
    %25 = vector.shape_cast %24 : vector<1x32x8xbf16> to vector<32x8xbf16>
    %cst_20 = arith.constant dense<0.000000e+00> : vector<8x8xf32>
    %26 = tpu.matmul %15, %25, %cst_20 {dimension_numbers = #tpu.dot_dimension_numbers<[1], [0], [0], [1], [0, 0, 1, 1], [], []>} : vector<8x32xbf16>, vector<32x8xbf16>, vector<8x8xf32> -> vector<8x8xf32>
    %27 = arith.truncf %20 : vector<8x8xf32> to vector<8x8xbf16>
    %28 = arith.truncf %23 : vector<8x8xf32> to vector<8x8xbf16>
    %cst_21 = arith.constant dense<0.000000e+00> : vector<8x8xf32>
    %29 = tpu.matmul %27, %28, %cst_21 {dimension_numbers = #tpu.dot_dimension_numbers<[1], [1], [0], [0], [0, 0, 1, 0], [], []>} : vector<8x8xbf16>, vector<8x8xbf16>, vector<8x8xf32> -> vector<8x8xf32>
    %cst_22 = arith.constant 0.353553385 : f32
    %30 = vector.broadcast %cst_22 : f32 to vector<8x8xf32>
    %31 = arith.mulf %29, %30 : vector<8x8xf32>
    %32 = arith.addf %31, %16 : vector<8x8xf32>
    %cst_23 = arith.constant dense<0xFF800000> : vector<8xf32>
    %33 = vector.multi_reduction <maximumf>, %32, %cst_23 [1] : vector<8x8xf32> to vector<8xf32>
    %34 = vector.shape_cast %33 : vector<8xf32> to vector<8x1xf32>
    %35 = vector.broadcast %34 : vector<8x1xf32> to vector<8x8xf32>
    %36 = arith.subf %32, %35 : vector<8x8xf32>
    %37 = math.exp %36 : vector<8x8xf32>
    %cst_24 = arith.constant dense<0.000000e+00> : vector<8xf32>
    %38 = vector.multi_reduction <add>, %37, %cst_24 [1] : vector<8x8xf32> to vector<8xf32>
    %39 = vector.shape_cast %38 : vector<8xf32> to vector<8x1xf32>
    %40 = tpu.reciprocal %39 : vector<8x1xf32> -> vector<8x1xf32>
    %41 = vector.broadcast %40 : vector<8x1xf32> to vector<8x8xf32>
    %42 = arith.mulf %37, %41 : vector<8x8xf32>
    %43 = arith.truncf %42 : vector<8x8xf32> to vector<8x8xbf16>
    %44 = arith.truncf %26 : vector<8x8xf32> to vector<8x8xbf16>
    %cst_25 = arith.constant dense<0.000000e+00> : vector<8x8xf32>
    %45 = tpu.matmul %43, %44, %cst_25 {dimension_numbers = #tpu.dot_dimension_numbers<[1], [0], [0], [1], [0, 0, 1, 1], [], []>} : vector<8x8xbf16>, vector<8x8xbf16>, vector<8x8xf32> -> vector<8x8xf32>
    %46 = arith.truncf %45 : vector<8x8xf32> to vector<8x8xbf16>
    %c0_26 = arith.constant 0 : index
    %c0_27 = arith.constant 0 : index
    %c0_28 = arith.constant 0 : index
    %47 = vector.load %arg8[%c0_26, %c0_27, %c0_28] : memref<4x8x32xbf16, #tpu.memory_space<vmem>>, vector<1x8x32xbf16>
    %48 = vector.shape_cast %47 : vector<1x8x32xbf16> to vector<8x32xbf16>
    %cst_29 = arith.constant dense<0.000000e+00> : vector<8x32xf32>
    %49 = tpu.matmul %46, %48, %cst_29 {dimension_numbers = #tpu.dot_dimension_numbers<[1], [0], [0], [1], [0, 0, 1, 1], [], []>} : vector<8x8xbf16>, vector<8x32xbf16>, vector<8x32xf32> -> vector<8x32xf32>
    %50 = arith.addf %17, %49 : vector<8x32xf32>
    %c1 = arith.constant 1 : index
    %c0_30 = arith.constant 0 : index
    %c0_31 = arith.constant 0 : index
    %51 = vector.load %arg5[%c1, %c0_30, %c0_31] : memref<4x32x8xbf16, #tpu.memory_space<vmem>>, vector<1x32x8xbf16>
    %52 = vector.shape_cast %51 : vector<1x32x8xbf16> to vector<32x8xbf16>
    %cst_32 = arith.constant dense<0.000000e+00> : vector<8x8xf32>
    %53 = tpu.matmul %15, %52, %cst_32 {dimension_numbers = #tpu.dot_dimension_numbers<[1], [0], [0], [1], [0, 0, 1, 1], [], []>} : vector<8x32xbf16>, vector<32x8xbf16>, vector<8x8xf32> -> vector<8x8xf32>
    %c1_33 = arith.constant 1 : index
    %c0_34 = arith.constant 0 : index
    %c0_35 = arith.constant 0 : index
    %54 = vector.load %arg6[%c1_33, %c0_34, %c0_35] : memref<4x32x8xbf16, #tpu.memory_space<vmem>>, vector<1x32x8xbf16>
    %55 = vector.shape_cast %54 : vector<1x32x8xbf16> to vector<32x8xbf16>
    %cst_36 = arith.constant dense<0.000000e+00> : vector<8x8xf32>
    %56 = tpu.matmul %15, %55, %cst_36 {dimension_numbers = #tpu.dot_dimension_numbers<[1], [0], [0], [1], [0, 0, 1, 1], [], []>} : vector<8x32xbf16>, vector<32x8xbf16>, vector<8x8xf32> -> vector<8x8xf32>
    %c1_37 = arith.constant 1 : index
    %c0_38 = arith.constant 0 : index
    %c0_39 = arith.constant 0 : index
    %57 = vector.load %arg7[%c1_37, %c0_38, %c0_39] : memref<4x32x8xbf16, #tpu.memory_space<vmem>>, vector<1x32x8xbf16>
    %58 = vector.shape_cast %57 : vector<1x32x8xbf16> to vector<32x8xbf16>
    %cst_40 = arith.constant dense<0.000000e+00> : vector<8x8xf32>
    %59 = tpu.matmul %15, %58, %cst_40 {dimension_numbers = #tpu.dot_dimension_numbers<[1], [0], [0], [1], [0, 0, 1, 1], [], []>} : vector<8x32xbf16>, vector<32x8xbf16>, vector<8x8xf32> -> vector<8x8xf32>
    %60 = arith.truncf %53 : vector<8x8xf32> to vector<8x8xbf16>
    %61 = arith.truncf %56 : vector<8x8xf32> to vector<8x8xbf16>
    %cst_41 = arith.constant dense<0.000000e+00> : vector<8x8xf32>
    %62 = tpu.matmul %60, %61, %cst_41 {dimension_numbers = #tpu.dot_dimension_numbers<[1], [1], [0], [0], [0, 0, 1, 0], [], []>} : vector<8x8xbf16>, vector<8x8xbf16>, vector<8x8xf32> -> vector<8x8xf32>
    %cst_42 = arith.constant 0.353553385 : f32
    %63 = vector.broadcast %cst_42 : f32 to vector<8x8xf32>
    %64 = arith.mulf %62, %63 : vector<8x8xf32>
    %65 = arith.addf %64, %16 : vector<8x8xf32>
    %cst_43 = arith.constant dense<0xFF800000> : vector<8xf32>
    %66 = vector.multi_reduction <maximumf>, %65, %cst_43 [1] : vector<8x8xf32> to vector<8xf32>
    %67 = vector.shape_cast %66 : vector<8xf32> to vector<8x1xf32>
    %68 = vector.broadcast %67 : vector<8x1xf32> to vector<8x8xf32>
    %69 = arith.subf %65, %68 : vector<8x8xf32>
    %70 = math.exp %69 : vector<8x8xf32>
    %cst_44 = arith.constant dense<0.000000e+00> : vector<8xf32>
    %71 = vector.multi_reduction <add>, %70, %cst_44 [1] : vector<8x8xf32> to vector<8xf32>
    %72 = vector.shape_cast %71 : vector<8xf32> to vector<8x1xf32>
    %73 = tpu.reciprocal %72 : vector<8x1xf32> -> vector<8x1xf32>
    %74 = vector.broadcast %73 : vector<8x1xf32> to vector<8x8xf32>
    %75 = arith.mulf %70, %74 : vector<8x8xf32>
    %76 = arith.truncf %75 : vector<8x8xf32> to vector<8x8xbf16>
    %77 = arith.truncf %59 : vector<8x8xf32> to vector<8x8xbf16>
    %cst_45 = arith.constant dense<0.000000e+00> : vector<8x8xf32>
    %78 = tpu.matmul %76, %77, %cst_45 {dimension_numbers = #tpu.dot_dimension_numbers<[1], [0], [0], [1], [0, 0, 1, 1], [], []>} : vector<8x8xbf16>, vector<8x8xbf16>, vector<8x8xf32> -> vector<8x8xf32>
    %79 = arith.truncf %78 : vector<8x8xf32> to vector<8x8xbf16>
    %c1_46 = arith.constant 1 : index
    %c0_47 = arith.constant 0 : index
    %c0_48 = arith.constant 0 : index
    %80 = vector.load %arg8[%c1_46, %c0_47, %c0_48] : memref<4x8x32xbf16, #tpu.memory_space<vmem>>, vector<1x8x32xbf16>
    %81 = vector.shape_cast %80 : vector<1x8x32xbf16> to vector<8x32xbf16>
    %cst_49 = arith.constant dense<0.000000e+00> : vector<8x32xf32>
    %82 = tpu.matmul %79, %81, %cst_49 {dimension_numbers = #tpu.dot_dimension_numbers<[1], [0], [0], [1], [0, 0, 1, 1], [], []>} : vector<8x8xbf16>, vector<8x32xbf16>, vector<8x32xf32> -> vector<8x32xf32>
    %83 = arith.addf %50, %82 : vector<8x32xf32>
    %c2 = arith.constant 2 : index
    %c0_50 = arith.constant 0 : index
    %c0_51 = arith.constant 0 : index
    %84 = vector.load %arg5[%c2, %c0_50, %c0_51] : memref<4x32x8xbf16, #tpu.memory_space<vmem>>, vector<1x32x8xbf16>
    %85 = vector.shape_cast %84 : vector<1x32x8xbf16> to vector<32x8xbf16>
    %cst_52 = arith.constant dense<0.000000e+00> : vector<8x8xf32>
    %86 = tpu.matmul %15, %85, %cst_52 {dimension_numbers = #tpu.dot_dimension_numbers<[1], [0], [0], [1], [0, 0, 1, 1], [], []>} : vector<8x32xbf16>, vector<32x8xbf16>, vector<8x8xf32> -> vector<8x8xf32>
    %c2_53 = arith.constant 2 : index
    %c0_54 = arith.constant 0 : index
    %c0_55 = arith.constant 0 : index
    %87 = vector.load %arg6[%c2_53, %c0_54, %c0_55] : memref<4x32x8xbf16, #tpu.memory_space<vmem>>, vector<1x32x8xbf16>
    %88 = vector.shape_cast %87 : vector<1x32x8xbf16> to vector<32x8xbf16>
    %cst_56 = arith.constant dense<0.000000e+00> : vector<8x8xf32>
    %89 = tpu.matmul %15, %88, %cst_56 {dimension_numbers = #tpu.dot_dimension_numbers<[1], [0], [0], [1], [0, 0, 1, 1], [], []>} : vector<8x32xbf16>, vector<32x8xbf16>, vector<8x8xf32> -> vector<8x8xf32>
    %c2_57 = arith.constant 2 : index
    %c0_58 = arith.constant 0 : index
    %c0_59 = arith.constant 0 : index
    %90 = vector.load %arg7[%c2_57, %c0_58, %c0_59] : memref<4x32x8xbf16, #tpu.memory_space<vmem>>, vector<1x32x8xbf16>
    %91 = vector.shape_cast %90 : vector<1x32x8xbf16> to vector<32x8xbf16>
    %cst_60 = arith.constant dense<0.000000e+00> : vector<8x8xf32>
    %92 = tpu.matmul %15, %91, %cst_60 {dimension_numbers = #tpu.dot_dimension_numbers<[1], [0], [0], [1], [0, 0, 1, 1], [], []>} : vector<8x32xbf16>, vector<32x8xbf16>, vector<8x8xf32> -> vector<8x8xf32>
    %93 = arith.truncf %86 : vector<8x8xf32> to vector<8x8xbf16>
    %94 = arith.truncf %89 : vector<8x8xf32> to vector<8x8xbf16>
    %cst_61 = arith.constant dense<0.000000e+00> : vector<8x8xf32>
    %95 = tpu.matmul %93, %94, %cst_61 {dimension_numbers = #tpu.dot_dimension_numbers<[1], [1], [0], [0], [0, 0, 1, 0], [], []>} : vector<8x8xbf16>, vector<8x8xbf16>, vector<8x8xf32> -> vector<8x8xf32>
    %cst_62 = arith.constant 0.353553385 : f32
    %96 = vector.broadcast %cst_62 : f32 to vector<8x8xf32>
    %97 = arith.mulf %95, %96 : vector<8x8xf32>
    %98 = arith.addf %97, %16 : vector<8x8xf32>
    %cst_63 = arith.constant dense<0xFF800000> : vector<8xf32>
    %99 = vector.multi_reduction <maximumf>, %98, %cst_63 [1] : vector<8x8xf32> to vector<8xf32>
    %100 = vector.shape_cast %99 : vector<8xf32> to vector<8x1xf32>
    %101 = vector.broadcast %100 : vector<8x1xf32> to vector<8x8xf32>
    %102 = arith.subf %98, %101 : vector<8x8xf32>
    %103 = math.exp %102 : vector<8x8xf32>
    %cst_64 = arith.constant dense<0.000000e+00> : vector<8xf32>
    %104 = vector.multi_reduction <add>, %103, %cst_64 [1] : vector<8x8xf32> to vector<8xf32>
    %105 = vector.shape_cast %104 : vector<8xf32> to vector<8x1xf32>
    %106 = tpu.reciprocal %105 : vector<8x1xf32> -> vector<8x1xf32>
    %107 = vector.broadcast %106 : vector<8x1xf32> to vector<8x8xf32>
    %108 = arith.mulf %103, %107 : vector<8x8xf32>
    %109 = arith.truncf %108 : vector<8x8xf32> to vector<8x8xbf16>
    %110 = arith.truncf %92 : vector<8x8xf32> to vector<8x8xbf16>
    %cst_65 = arith.constant dense<0.000000e+00> : vector<8x8xf32>
    %111 = tpu.matmul %109, %110, %cst_65 {dimension_numbers = #tpu.dot_dimension_numbers<[1], [0], [0], [1], [0, 0, 1, 1], [], []>} : vector<8x8xbf16>, vector<8x8xbf16>, vector<8x8xf32> -> vector<8x8xf32>
    %112 = arith.truncf %111 : vector<8x8xf32> to vector<8x8xbf16>
    %c2_66 = arith.constant 2 : index
    %c0_67 = arith.constant 0 : index
    %c0_68 = arith.constant 0 : index
    %113 = vector.load %arg8[%c2_66, %c0_67, %c0_68] : memref<4x8x32xbf16, #tpu.memory_space<vmem>>, vector<1x8x32xbf16>
    %114 = vector.shape_cast %113 : vector<1x8x32xbf16> to vector<8x32xbf16>
    %cst_69 = arith.constant dense<0.000000e+00> : vector<8x32xf32>
    %115 = tpu.matmul %112, %114, %cst_69 {dimension_numbers = #tpu.dot_dimension_numbers<[1], [0], [0], [1], [0, 0, 1, 1], [], []>} : vector<8x8xbf16>, vector<8x32xbf16>, vector<8x32xf32> -> vector<8x32xf32>
    %116 = arith.addf %83, %115 : vector<8x32xf32>
    %c3 = arith.constant 3 : index
    %c0_70 = arith.constant 0 : index
    %c0_71 = arith.constant 0 : index
    %117 = vector.load %arg5[%c3, %c0_70, %c0_71] : memref<4x32x8xbf16, #tpu.memory_space<vmem>>, vector<1x32x8xbf16>
    %118 = vector.shape_cast %117 : vector<1x32x8xbf16> to vector<32x8xbf16>
    %cst_72 = arith.constant dense<0.000000e+00> : vector<8x8xf32>
    %119 = tpu.matmul %15, %118, %cst_72 {dimension_numbers = #tpu.dot_dimension_numbers<[1], [0], [0], [1], [0, 0, 1, 1], [], []>} : vector<8x32xbf16>, vector<32x8xbf16>, vector<8x8xf32> -> vector<8x8xf32>
    %c3_73 = arith.constant 3 : index
    %c0_74 = arith.constant 0 : index
    %c0_75 = arith.constant 0 : index
    %120 = vector.load %arg6[%c3_73, %c0_74, %c0_75] : memref<4x32x8xbf16, #tpu.memory_space<vmem>>, vector<1x32x8xbf16>
    %121 = vector.shape_cast %120 : vector<1x32x8xbf16> to vector<32x8xbf16>
    %cst_76 = arith.constant dense<0.000000e+00> : vector<8x8xf32>
    %122 = tpu.matmul %15, %121, %cst_76 {dimension_numbers = #tpu.dot_dimension_numbers<[1], [0], [0], [1], [0, 0, 1, 1], [], []>} : vector<8x32xbf16>, vector<32x8xbf16>, vector<8x8xf32> -> vector<8x8xf32>
    %c3_77 = arith.constant 3 : index
    %c0_78 = arith.constant 0 : index
    %c0_79 = arith.constant 0 : index
    %123 = vector.load %arg7[%c3_77, %c0_78, %c0_79] : memref<4x32x8xbf16, #tpu.memory_space<vmem>>, vector<1x32x8xbf16>
    %124 = vector.shape_cast %123 : vector<1x32x8xbf16> to vector<32x8xbf16>
    %cst_80 = arith.constant dense<0.000000e+00> : vector<8x8xf32>
    %125 = tpu.matmul %15, %124, %cst_80 {dimension_numbers = #tpu.dot_dimension_numbers<[1], [0], [0], [1], [0, 0, 1, 1], [], []>} : vector<8x32xbf16>, vector<32x8xbf16>, vector<8x8xf32> -> vector<8x8xf32>
    %126 = arith.truncf %119 : vector<8x8xf32> to vector<8x8xbf16>
    %127 = arith.truncf %122 : vector<8x8xf32> to vector<8x8xbf16>
    %cst_81 = arith.constant dense<0.000000e+00> : vector<8x8xf32>
    %128 = tpu.matmul %126, %127, %cst_81 {dimension_numbers = #tpu.dot_dimension_numbers<[1], [1], [0], [0], [0, 0, 1, 0], [], []>} : vector<8x8xbf16>, vector<8x8xbf16>, vector<8x8xf32> -> vector<8x8xf32>
    %cst_82 = arith.constant 0.353553385 : f32
    %129 = vector.broadcast %cst_82 : f32 to vector<8x8xf32>
    %130 = arith.mulf %128, %129 : vector<8x8xf32>
    %131 = arith.addf %130, %16 : vector<8x8xf32>
    %cst_83 = arith.constant dense<0xFF800000> : vector<8xf32>
    %132 = vector.multi_reduction <maximumf>, %131, %cst_83 [1] : vector<8x8xf32> to vector<8xf32>
    %133 = vector.shape_cast %132 : vector<8xf32> to vector<8x1xf32>
    %134 = vector.broadcast %133 : vector<8x1xf32> to vector<8x8xf32>
    %135 = arith.subf %131, %134 : vector<8x8xf32>
    %136 = math.exp %135 : vector<8x8xf32>
    %cst_84 = arith.constant dense<0.000000e+00> : vector<8xf32>
    %137 = vector.multi_reduction <add>, %136, %cst_84 [1] : vector<8x8xf32> to vector<8xf32>
    %138 = vector.shape_cast %137 : vector<8xf32> to vector<8x1xf32>
    %139 = tpu.reciprocal %138 : vector<8x1xf32> -> vector<8x1xf32>
    %140 = vector.broadcast %139 : vector<8x1xf32> to vector<8x8xf32>
    %141 = arith.mulf %136, %140 : vector<8x8xf32>
    %142 = arith.truncf %141 : vector<8x8xf32> to vector<8x8xbf16>
    %143 = arith.truncf %125 : vector<8x8xf32> to vector<8x8xbf16>
    %cst_85 = arith.constant dense<0.000000e+00> : vector<8x8xf32>
    %144 = tpu.matmul %142, %143, %cst_85 {dimension_numbers = #tpu.dot_dimension_numbers<[1], [0], [0], [1], [0, 0, 1, 1], [], []>} : vector<8x8xbf16>, vector<8x8xbf16>, vector<8x8xf32> -> vector<8x8xf32>
    %145 = arith.truncf %144 : vector<8x8xf32> to vector<8x8xbf16>
    %c3_86 = arith.constant 3 : index
    %c0_87 = arith.constant 0 : index
    %c0_88 = arith.constant 0 : index
    %146 = vector.load %arg8[%c3_86, %c0_87, %c0_88] : memref<4x8x32xbf16, #tpu.memory_space<vmem>>, vector<1x8x32xbf16>
    %147 = vector.shape_cast %146 : vector<1x8x32xbf16> to vector<8x32xbf16>
    %cst_89 = arith.constant dense<0.000000e+00> : vector<8x32xf32>
    %148 = tpu.matmul %145, %147, %cst_89 {dimension_numbers = #tpu.dot_dimension_numbers<[1], [0], [0], [1], [0, 0, 1, 1], [], []>} : vector<8x8xbf16>, vector<8x32xbf16>, vector<8x32xf32> -> vector<8x32xf32>
    %149 = arith.addf %116, %148 : vector<8x32xf32>
    %150 = arith.addf %1, %149 : vector<8x32xf32>
    %151 = arith.mulf %150, %150 : vector<8x32xf32>
    %cst_90 = arith.constant dense<0.000000e+00> : vector<8xf32>
    %152 = vector.multi_reduction <add>, %151, %cst_90 [1] : vector<8x32xf32> to vector<8xf32>
    %153 = vector.shape_cast %152 : vector<8xf32> to vector<8x1xf32>
    %cst_91 = arith.constant 3.125000e-02 : f32
    %154 = vector.broadcast %cst_91 : f32 to vector<8x1xf32>
    %155 = arith.mulf %153, %154 : vector<8x1xf32>
    %cst_92 = arith.constant 9.99999974E-6 : f32
    %156 = vector.broadcast %cst_92 : f32 to vector<8x1xf32>
    %157 = arith.addf %155, %156 : vector<8x1xf32>
    %158 = math.rsqrt %157 : vector<8x1xf32>
    %159 = vector.broadcast %158 : vector<8x1xf32> to vector<8x32xf32>
    %160 = arith.mulf %150, %159 : vector<8x32xf32>
    %c0_93 = arith.constant 0 : index
    %c0_94 = arith.constant 0 : index
    %161 = vector.load %arg4[%c0_93, %c0_94] : memref<1x32xf32, #tpu.memory_space<vmem>>, vector<1x32xf32>
    %162 = vector.broadcast %161 : vector<1x32xf32> to vector<8x32xf32>
    %163 = arith.mulf %160, %162 : vector<8x32xf32>
    %164 = arith.truncf %163 : vector<8x32xf32> to vector<8x32xbf16>
    %c0_95 = arith.constant 0 : index
    %c0_96 = arith.constant 0 : index
    %165 = vector.load %arg9[%c0_95, %c0_96] : memref<32x128xbf16, #tpu.memory_space<vmem>>, vector<32x128xbf16>
    %cst_97 = arith.constant dense<0.000000e+00> : vector<8x128xf32>
    %166 = tpu.matmul %164, %165, %cst_97 {dimension_numbers = #tpu.dot_dimension_numbers<[1], [0], [0], [1], [0, 0, 1, 1], [], []>} : vector<8x32xbf16>, vector<32x128xbf16>, vector<8x128xf32> -> vector<8x128xf32>
    %167 = arith.negf %166 : vector<8x128xf32>
    %168 = math.exp %167 : vector<8x128xf32>
    %cst_98 = arith.constant 1.000000e+00 : f32
    %169 = vector.broadcast %cst_98 : f32 to vector<8x128xf32>
    %170 = arith.addf %169, %168 : vector<8x128xf32>
    %171 = arith.divf %169, %170 : vector<8x128xf32>
    %172 = arith.mulf %166, %171 : vector<8x128xf32>
    %173 = arith.truncf %172 : vector<8x128xf32> to vector<8x128xbf16>
    %c0_99 = arith.constant 0 : index
    %c0_100 = arith.constant 0 : index
    %174 = vector.load %arg10[%c0_99, %c0_100] : memref<128x32xbf16, #tpu.memory_space<vmem>>, vector<128x32xbf16>
    %cst_101 = arith.constant dense<0.000000e+00> : vector<8x32xf32>
    %175 = tpu.matmul %173, %174, %cst_101 {dimension_numbers = #tpu.dot_dimension_numbers<[1], [0], [0], [1], [0, 0, 1, 1], [], []>} : vector<8x128xbf16>, vector<128x32xbf16>, vector<8x32xf32> -> vector<8x32xf32>
    %176 = arith.addf %150, %175 : vector<8x32xf32>
    %c0_102 = arith.constant 0 : index
    %c0_103 = arith.constant 0 : index
    %c0_104 = arith.constant 0 : index
    %177 = vector.load %arg11[%c0_102, %c0_103, %c0_104] : memref<1x8x32xf32, #tpu.memory_space<vmem>>, vector<1x8x32xf32>
    %178 = vector.shape_cast %177 : vector<1x8x32xf32> to vector<8x32xf32>
    %179 = vector.shape_cast %176 : vector<8x32xf32> to vector<1x8x32xf32>
    tpu.vector_store %arg11[%c0_102, %c0_103, %c0_104], %179 {strides = array<i32>} : memref<1x8x32xf32, #tpu.memory_space<vmem>>, vector<1x8x32xf32>,
    return
  }
  func.func @transform_0(%arg0: i32) -> (i32, i32, i32) {
    %c0_i32 = arith.constant 0 : i32
    %c0_i32_0 = arith.constant 0 : i32
    %c0_i32_1 = arith.constant 0 : i32
    return %arg0, %c0_i32, %c0_i32_0 : i32, i32, i32
  }
  func.func @transform_1(%arg0: i32) -> (i32, i32) {
    %c0_i32 = arith.constant 0 : i32
    %c0_i32_0 = arith.constant 0 : i32
    %c0_i32_1 = arith.constant 0 : i32
    return %c0_i32, %c0_i32_0 : i32, i32
  }
  func.func @transform_2(%arg0: i32) -> (i32, i32) {
    %c0_i32 = arith.constant 0 : i32
    %c0_i32_0 = arith.constant 0 : i32
    %c0_i32_1 = arith.constant 0 : i32
    return %c0_i32, %c0_i32_0 : i32, i32
  }
  func.func @transform_3(%arg0: i32) -> (i32, i32) {
    %c0_i32 = arith.constant 0 : i32
    %c0_i32_0 = arith.constant 0 : i32
    %c0_i32_1 = arith.constant 0 : i32
    return %c0_i32, %c0_i32_0 : i32, i32
  }
  func.func @transform_4(%arg0: i32) -> (i32, i32, i32) {
    %c0_i32 = arith.constant 0 : i32
    %c0_i32_0 = arith.constant 0 : i32
    %c0_i32_1 = arith.constant 0 : i32
    %c0_i32_2 = arith.constant 0 : i32
    return %c0_i32, %c0_i32_0, %c0_i32_1 : i32, i32, i32
  }
  func.func @transform_5(%arg0: i32) -> (i32, i32, i32) {
    %c0_i32 = arith.constant 0 : i32
    %c0_i32_0 = arith.constant 0 : i32
    %c0_i32_1 = arith.constant 0 : i32
    %c0_i32_2 = arith.constant 0 : i32
    return %c0_i32, %c0_i32_0, %c0_i32_1 : i32, i32, i32
  }
  func.func @transform_6(%arg0: i32) -> (i32, i32, i32) {
    %c0_i32 = arith.constant 0 : i32
    %c0_i32_0 = arith.constant 0 : i32
    %c0_i32_1 = arith.constant 0 : i32
    %c0_i32_2 = arith.constant 0 : i32
    return %c0_i32, %c0_i32_0, %c0_i32_1 : i32, i32, i32
  }
  func.func @transform_7(%arg0: i32) -> (i32, i32, i32) {
    %c0_i32 = arith.constant 0 : i32
    %c0_i32_0 = arith.constant 0 : i32
    %c0_i32_1 = arith.constant 0 : i32
    %c0_i32_2 = arith.constant 0 : i32
    return %c0_i32, %c0_i32_0, %c0_i32_1 : i32, i32, i32
  }
  func.func @transform_8(%arg0: i32) -> (i32, i32) {
    %c0_i32 = arith.constant 0 : i32
    %c0_i32_0 = arith.constant 0 : i32
    %c0_i32_1 = arith.constant 0 : i32
    return %c0_i32, %c0_i32_0 : i32, i32
  }
  func.func @transform_9(%arg0: i32) -> (i32, i32) {
    %c0_i32 = arith.constant 0 : i32
    %c0_i32_0 = arith.constant 0 : i32
    %c0_i32_1 = arith.constant 0 : i32
    return %c0_i32, %c0_i32_0 : i32, i32
  }
  func.func @transform_10(%arg0: i32) -> (i32, i32, i32) {
    %c0_i32 = arith.constant 0 : i32
    %c0_i32_0 = arith.constant 0 : i32
    %c0_i32_1 = arith.constant 0 : i32
    return %arg0, %c0_i32, %c0_i32_0 : i32, i32, i32
  }
}

</mosaic_0001>

<bundles_post_ra>
// kernel: transformer_block.1
= control target key start
LH: loop header
LB: loop body
LE: loop exit
PB: predicated region body
PF: predicated region fallthrough
CT: control target
= control target key end

     0   :  { %15 = vsyncpa [#allocation3], 0  ;;  %s2957_s0 = inlined_call_operand.vmem [shape: f32[2,8,32], index: 0, kind: input, shape index: {}]   ;;  %s2958_s1 = inlined_call_operand.vmem [shape: f32[8,8], index: 1, kind: input, shape index: {}]   ;;  %s2959_s2 = inlined_call_operand.vmem [shape: f32[1,32], index: 2, kind: input, shape index: {}]   ;;  %s2960_s3 = inlined_call_operand.vmem [shape: f32[1,32], index: 3, kind: input, shape index: {}]   ;;  %s2961_s4 = inlined_call_operand.vmem [shape: bf16[4,32,8], index: 4, kind: input, shape index: {}]   ;;  %s2962_s5 = inlined_call_operand.vmem [shape: bf16[4,32,8], index: 5, kind: input, shape index: {}]   ;;  %s2963_s6 = inlined_call_operand.vmem [shape: bf16[4,32,8], index: 6, kind: input, shape index: {}]   ;;  %s2964_s7 = inlined_call_operand.vmem [shape: bf16[4,8,32], index: 7, kind: input, shape index: {}]   ;;  %s2965_s8 = inlined_call_operand.vmem [shape: bf16[32,128], index: 8, kind: input, shape index: {}]   ;;  %s2966_s9 = inlined_call_operand.vmem [shape: bf16[128,32], index: 9, kind: input, shape index: {}]   ;;  %s2967_s10 = inlined_call_operand.hbm [shape: f32[2,8,32], index: 10, kind: output, shape index: {}]  }
   0x1   :  { %17 = vsyncpa [#allocation3 + $0x1], 0  ;;  %s2559_s13 = smov 0   ;;  %s2561_s14 = smov 0  }
   0x2   :  { %s2563_s15 = smov 0   ;;  %s2565_s16 = smov 0  }
   0x3 LB: > { %s2580_s17 = sadd.s32 4294967295, %s2499_s16   ;;  %s1959_s18 = sadd.s32 4294967294, %s2499_s16   ;;  %s2499_s16 = sphi %s2565_s16, %s2973_s16   ;;  %s2495_s15 = sphi %s2563_s15, %s2972_s15   ;;  %s2491_s14 = sphi %s2561_s14, %s2971_s14   ;;  %s2487_s13 = sphi %s2559_s13, %s2970_s13  }
   0x4   : > { %s2584_s19 = sadd.s32 1, %s2499_s16   ;;  %s245_s20 = sadd.s32 1, %s2495_s15 }
   0x5   : > { %s242_s21 = ssub.s32 %s2499_s16, %s2584_s19  ;;  %p255_p0 = scmp.ne.s32.totalorder %s2495_s15, %s2491_s14 }
   0x6   : > { %p243_p1 = scmp.eq.s32.totalorder %s242_s21, 0  ;;  %p256_p2 = scmp.eq.s32.totalorder %s2580_s17, 1 }
   0x7   : > { %p261_p3 = scmp.ne.s32.totalorder %s2491_s14, %s2487_s13  ;;  %p262_p4 = scmp.eq.s32.totalorder %s1959_s18, 1 }
   0x8   : > { %s2595_s22 = scalar_select %p243_p1, %s2495_s15, %s245_s20  }
   0x9   : > { %p2597_p5 = por %p256_p2, %p255_p0  ;;  %p2601_p6 = por %p262_p4, %p261_p3 }
   0xa   : > { %p1962_p7 = scmp.ge.s32.totalorder %s2499_s16, 1  ;;  %p314_p8 = scmp.lt.s32.totalorder %s2499_s16, 3 }
   0xc   : > { %p315_p9 = pnand %p1962_p7, %p314_p8 }
   0xd   : > { %p351_p10 = scmp.lt.s32.totalorder (!%p315_p9), %s2580_s17, 1  ;;  %vm358_vm0 = vcmask (!%p315_p9), 261120   ;;  %v2379_v3 = vld [vmem:[%s2961_s4] sm:$0xff] (!%p315_p9)   ;;  %v2501_v4 = vmov (!%p315_p9), 0.0   ;;  %v2380_v5 = vld [vmem:[%s2961_s4 + $0x8] sm:$0xff] (!%p315_p9)   ;;  %vm2502_vm1 = vmmov (!%p315_p9), 0  }
   0xe   : > { %318 = sbr.rel (%p315_p9) target bundleno = 4726 (0x1276), region = 60  ;;  %2142 = vmatprep.subr.bf16.mxu0 (!%p315_p9), %v2501_v4  ;;  %2166 = vmatprep.subr.bf16.mxu1 (!%p315_p9), %v2501_v4  ;;  %v1965_v10 = vld [vmem:[%s2959_s2] ss:$0 sm:$0xff] (!%p315_p9)  ;;  %v2382_v15 = vld [vmem:[%s2962_s5 + $0x8] sm:$0xff] (!%p315_p9)   ;;  %vm549_vm2 = vcmask (!%p315_p9), 64512   ;;  %vm614_vm3 = vcmask (!%p315_p9), 1043456  }
   0xf   : > { %2143 = vmatpush3.bf16.msra.mxu0 (!%p315_p9), %v2379_v3  ;;  %2146 = vmatprep.mubr.msk.bf16.mxu0 (!%p315_p9), %vm2502_vm1, %v2501_v4  ;;  %v2381_v13 = vld [vmem:[%s2962_s5] sm:$0xff] (!%p315_p9)   ;;  %v2384_v17 = vld [vmem:[%s2963_s6 + $0x8] sm:$0xff] (!%p315_p9)   ;;  %v2385_v29 = vld [vmem:[%s2961_s4 + $0x10] sm:$0xff] (!%p315_p9)   ;;  %s348_s21 = sand.u32 (!%p315_p9), 1, %s2491_s14   ;;  %s2503_s18 = smov (!%p315_p9), [#allocation2]  }
  0x10   : > { %2144 = vmatprep.subr.bf16.mxu0 (!%p315_p9), %v2501_v4  ;;  %2168 = vmatprep.mubr.msk.bf16.mxu1 (!%p315_p9), %vm2502_vm1, %v2501_v4  ;;  %v2383_v16 = vld [vmem:[%s2963_s6] sm:$0xff] (!%p315_p9)   ;;  %v2386_v36 = vld [vmem:[%s2961_s4 + $0x18] sm:$0xff] (!%p315_p9)   ;;  %v2387_v37 = vld [vmem:[%s2963_s6 + $0x10] sm:$0xff] (!%p315_p9)   ;;  %s2441_s20 = sshll.u32 (!%p315_p9), %s2503_s18, 4  ;;  %s2442_s20 = int_to_ptr.vmem [resolvable:$false] %s2441_s20 }
  0x11   : > { %v2388_v38 = vld [vmem:[%s2963_s6 + $0x18] sm:$0xff] (!%p315_p9)   ;;  %v2699_v40 = vld [vmem:[%s2958_s1] sm:$0xff] (!%p315_p9) }
  0x13   : > { %2145 = vmatpush3.bf16.msra.mxu0 (!%p315_p9), %v2380_v5  ;;  %v2390_v5 = vld [vmem:[%s2962_s5 + $0x18] sm:$0xff] (!%p315_p9)  }
  0x14   : > { %2150 = vmatprep.subr.bf16.mxu0 (!%p315_p9), %v2501_v4 }
  0x15   : > { %s352_s25 = scalar_select %p351_p10, %s2580_s17, 1 }
  0x17   : > { %s1964_s26 = sshll.u32 %s352_s25, 3  ;;  %s1963_s25 = sshll.u32 %s348_s21, 3 }
  0x18   : > { %s354_s29 = scalar_lea.vmem %s2957_s0, %s1964_s26  ;;  %s2067_s26 = sshll.u32 %s2580_s17, 7 }
  0x19   : > { %v2612_v0 = vld [vmem:[%s354_s29] sm:$0xff]  ;;  %s350_s27 = scalar_lea.vmem [#allocation2], %s1963_s25  ;;  %s2914_s11 = scalar_lea.hbm %s2967_s10, %s2067_s26 }
  0x1a   : > { %v357_v1 = vmul.f32 %v2612_v0, %v2612_v0  ;;  %s1900_s28 = sshll.u32 %s350_s27, 4  ;;  %s1887_s17 = scalar_lea.sflag [#allocation3], %s348_s21  ;;  %s2916_s28 = int_to_ptr.vmem [resolvable:$true] %s1900_s28 }
  0x1b   : > { %s2437_s12 = scalar_lea.vmem %s2916_s28, 128  ;;  %s2443_s25 = scalar_lea.vmem %s2442_s20, 256 }
  0x1c   : > { %v359_v2 = vsel %vm358_vm0, %v357_v1, 0.0  ;;  %p2438_p11 = scmp.ne.s32.totalorder %s2916_s28, %s2437_s12  ;;  %p2444_p0 = scmp.lt.s32.totalorder %s2916_s28, %s2442_s20 }
  0x1d   : > { %360 = vadd.xlane.f32.xlu0 %v359_v2  ;;  %v2389_v2 = vld [vmem:[%s2962_s5 + $0x10] sm:$0xff]   ;;  %p2445_p1 = scmp.lt.s32.totalorder %s2443_s25, %s2437_s12 }
  0x1e   : > { %p2439_p12 = pnand %p2438_p11, %p2597_p5 }
  0x1f   : > { %p2446_p2 = por %p2445_p1, %p2444_p0 }
  0x20   : > { %p2440_p13 = pneg %p2439_p12 }
  0x22   : > { %p2447_p3 = pnand %p2446_p2, %p2440_p13 }
  0xaa   : > { %v361_v6 = vpop.xlane.xlu0 %360 }
  0xab   : > { %v362_v7 = vmul.f32 0.03125, %v361_v6 }
  0xad   : > { %v363_v8 = vadd.f32 1e-05, %v362_v7 }
  0xaf   : > { %2413 = vrsqrt.f32 %v363_v8 }
  0xb9   : > { %v2414_v9 = vpop.eup %2413 }
  0xba   : > { %v365_v11 = vmul.f32 %v2414_v9, %v2612_v0 }
  0xbc   : > { %v373_v12 = vmul.f32 %v1965_v10, %v365_v11 }
  0xbe   : > { %v2638_v14 = vpack.c.bf16 %v373_v12, %v373_v12 }
  0xc0   : > { %2147 = vmatmul.mubr.msk.bf16.vlgmr.msra.gmra.mrb[0].mxu0 %vm358_vm0, %v2638_v14 }
  0xc1   : > { %2151 = vmatpush3.bf16.msra.mxu0 %v2381_v13  ;;  %2154 = vmatprep.mubr.msk.bf16.mxu0 %vm2502_vm1, %v2501_v4 }
  0xc2   : > { %2152 = vmatprep.subr.bf16.mxu0 %v2501_v4 }
  0xc5   : > { %2153 = vmatpush3.bf16.msra.mxu0 %v2382_v15 }
  0xc6   : > { %2158 = vmatprep.subr.bf16.mxu0 %v2501_v4 }
  0xc8   : > { %2155 = vmatmul.mubr.msk.bf16.vlgmr.msra.gmra.mrb[4].mxu0 %vm358_vm0, %v2638_v14 }
  0xc9   : > { %2159 = vmatpush3.bf16.msra.mxu0 %v2383_v16  ;;  %2162 = vmatprep.mubr.msk.bf16.mxu0 %vm2502_vm1, %v2501_v4 }
  0xca   : > { %2160 = vmatprep.subr.bf16.mxu0 %v2501_v4 }
  0xcd   : > { %2161 = vmatpush3.bf16.msra.mxu0 %v2384_v17 }
  0xce   : > { %2172 = vmatprep.subr.bf16.mxu0 %v2501_v4 }
  0xd0   : > { %2163 = vmatmul.mubr.msk.bf16.vlgmr.msra.gmra.mrb[8].mxu0 %vm358_vm0, %v2638_v14 }
  0xd1   : > { %2174 = vmatprep.mubr.msk.bf16.mxu0 %vm2502_vm1, %v2501_v4 }
 0x193   : > { %v429_v18 = vpop.f32.mrb[0].mxu0 }
 0x194   : > { %v2148_v19 = vpop.f32.mrb[1].mxu0  ;;  %v547_v30 = vpack.c.bf16 %v429_v18, %v429_v18 }
 0x195   : > { %v432_v20 = vpop.f32.mrb[2].mxu0 }
 0x196   : > { %v2149_v21 = vpop.f32.mrb[3].mxu0 }
 0x19b   : > { %v485_v22 = vpop.f32.mrb[4].mxu0 }
 0x19c   : > { %v548_v23 = vpack.c.bf16 %v485_v22, %v485_v22  ;;  %v2156_v24 = vpop.f32.mrb[5].mxu0 }
 0x19d   : > { %v488_v25 = vpop.f32.mrb[6].mxu0 }
 0x19e   : > { %v2157_v26 = vpop.f32.mrb[7].mxu0  ;;  %v554_v27 = vsel %vm549_vm2, %v548_v23, 0 }
 0x19f   : > { %2167 = vmatpush3.bf16.xpose.msra.mxu1 %v554_v27 }
 0x1a0   : > { %2178 = vmatprep.subr.bf16.mxu1 %v2501_v4 }
 0x1a3   : > { %v541_v28 = vpop.f32.mrb[8].mxu0 }
 0x1a4   : > { %v610_v31 = vpack.c.bf16 %v541_v28, %v541_v28  ;;  %v2164_v32 = vpop.f32.mrb[9].mxu0 }
 0x1a5   : > { %v544_v33 = vpop.f32.mrb[10].mxu0 }
 0x1a6   : > { %v616_v34 = vsel %vm614_vm3, %v610_v31, 0  ;;  %v2165_v35 = vpop.f32.mrb[11].mxu0  ;;  %2169 = vmatmul.mubr.msk.bf16.vlgmr.msra.gmra.mrb[0].mxu1 %vm549_vm2, %v547_v30  ;;  %v2000_v30 = vld [vmem:[%s2964_s7 + $0x4] sm:$0xf] }
 0x1a7   : > { %2173 = vmatpush3.bf16.msra.mxu0 %v616_v34  ;;  %2179 = vmatpush3.bf16.msra.mxu1 %v2385_v29  ;;  %v947_v31 = vsel %vm614_vm3, %v2000_v30, 0  ;;  %v659_v34 = vld [vmem:[%s2964_s7] sm:$0xf] }
 0x1a8   : > { %2180 = vmatprep.subr.bf16.mxu1 %v2501_v4  ;;  %2182 = vmatprep.mubr.msk.bf16.mxu1 %vm2502_vm1, %v2501_v4 }
 0x1a9   : > { %2186 = vmatprep.subr.bf16.mxu0 %v2501_v4 }
 0x1ab   : > { %2181 = vmatpush3.bf16.msra.mxu1 %v2386_v36 }
 0x1ac   : > { %2194 = vmatprep.subr.bf16.mxu1 %v2501_v4 }
 0x1ae   : > { %2183 = vmatmul.mubr.msk.bf16.vlgmr.msra.gmra.mrb[4].mxu1 %vm358_vm0, %v2638_v14 }
 0x1af   : > { %2195 = vmatpush3.bf16.msra.mxu1 %v2387_v37  ;;  %2198 = vmatprep.mubr.msk.bf16.mxu1 %vm2502_vm1, %v2501_v4  ;;  %v993_v37 = vsel %vm614_vm3, %v659_v34, 0 }
 0x1b0   : > { %2196 = vmatprep.subr.bf16.mxu1 %v2501_v4 }
 0x1b3   : > { %2197 = vmatpush3.bf16.msra.mxu1 %v2388_v38  ;;  %v2391_v38 = vld [vmem:[%s2962_s5 + $0x20] sm:$0xff]  }
 0x1b4   : > { %2208 = vmatprep.subr.bf16.mxu1 %v2501_v4 }
 0x1b6   : > { %2199 = vmatmul.mubr.msk.bf16.vlgmr.msra.gmra.mrb[8].mxu1 %vm358_vm0, %v2638_v14 }
 0x1b7   : > { %2210 = vmatprep.mubr.msk.bf16.mxu1 %vm2502_vm1, %v2501_v4 }
 0x279   : > { %v590_v39 = vpop.f32.mrb[0].mxu1 }
 0x27a   : > { %v596_v41 = vmul.f32 0.35355338, %v590_v39  ;;  %v2170_v42 = vpop.f32.mrb[1].mxu1 }
 0x27b   : > { %v593_v43 = vpop.f32.mrb[2].mxu1 }
 0x27c   : > { %v2171_v44 = vpop.f32.mrb[3].mxu1  ;;  %v597_v45 = vadd.f32 %v596_v41, %v2699_v40  ;;  %v2392_v41 = vld [vmem:[%s2962_s5 + $0x28] sm:$0xff]   ;;  %v2393_v43 = vld [vmem:[%s2961_s4 + $0x20] sm:$0xff]  }
 0x27e   : > { %v598_v46 = vsel %vm549_vm2, %v597_v45, -inf }
 0x27f   : > { %599 = vmax.xlane.f32.xlu0 %v598_v46 }
 0x281   : > { %v711_v47 = vpop.f32.mrb[4].mxu1 }
 0x282   : > { %v2184_v48 = vpop.f32.mrb[5].mxu1  ;;  %v831_v17 = vpack.c.bf16 %v711_v47, %v711_v47 }
 0x283   : > { %v714_v49 = vpop.f32.mrb[6].mxu1  ;;  %v2394_v48 = vld [vmem:[%s2961_s4 + $0x28] sm:$0xff]  }
 0x284   : > { %v2185_v50 = vpop.f32.mrb[7].mxu1 }
 0x285   : > { %v2395_v50 = vld [vmem:[%s2963_s6 + $0x20] sm:$0xff]  }
 0x289   : > { %v825_v51 = vpop.f32.mrb[8].mxu1 }
 0x28a   : > { %v893_v52 = vpack.c.bf16 %v825_v51, %v825_v51  ;;  %v2200_v53 = vpop.f32.mrb[9].mxu1 }
 0x28b   : > { %v828_v54 = vpop.f32.mrb[10].mxu1 }
 0x28c   : > { %v898_v55 = vsel %vm614_vm3, %v893_v52, 0  ;;  %v2201_v56 = vpop.f32.mrb[11].mxu1  ;;  %v2396_v54 = vld [vmem:[%s2963_s6 + $0x28] sm:$0xff]  }
 0x28d   : > { %2209 = vmatpush3.bf16.msra.mxu1 %v898_v55 }
 0x28e   : > { %2220 = vmatprep.subr.bf16.mxu1 %v2501_v4 }
 0x30c   : > { %v600_v57 = vpop.xlane.xlu0 %599 }
 0x30d   : > { %v601_v58 = vsub.f32 %v597_v45, %v600_v57 }
 0x30f   : > { %v602_v59 = vmul.f32 1.442695, %v601_v58 }
 0x311   : > { %2415 = vpow2.f32 %v602_v59 }
 0x31b   : > { %v2416_v60 = vpop.eup %2415 }
 0x31c   : > { %v604_v61 = vsel %vm549_vm2, %v2416_v60, 0.0 }
 0x31d   : > { %605 = vadd.xlane.f32.xlu1 %v604_v61 }
 0x3aa   : > { %v606_v62 = vpop.xlane.xlu1 %605 }
 0x3ab   : > { %2417 = vrcp.f32 %v606_v62 }
 0x3b5   : > { %v2418_v63 = vpop.eup %2417 }
 0x3b6   : > { %v608_v1 = vmul.f32 %v2418_v63, %v2416_v60 }
 0x3b8   : > { %v609_v3 = vpack.c.bf16 %v608_v1, %v608_v1 }
 0x3ba   : > { %2175 = vmatmul.mubr.msk.bf16.vlgmr.msra.gmra.mrb[12].mxu0 %vm549_vm2, %v609_v3 }
 0x3bb   : > { %2187 = vmatpush3.bf16.msra.mxu0 %v2389_v2  ;;  %2190 = vmatprep.mubr.msk.bf16.mxu0 %vm2502_vm1, %v2501_v4 }
 0x3bc   : > { %2188 = vmatprep.subr.bf16.mxu0 %v2501_v4 }
 0x3bf   : > { %2189 = vmatpush3.bf16.msra.mxu0 %v2390_v5 }
 0x3c0   : > { %2202 = vmatprep.subr.bf16.mxu0 %v2501_v4 }
 0x3c2   : > { %2191 = vmatmul.mubr.msk.bf16.vlgmr.msra.gmra.mrb[16].mxu0 %vm358_vm0, %v2638_v14 }
 0x3c3   : > { %2204 = vmatprep.mubr.msk.bf16.mxu0 %vm2502_vm1, %v2501_v4 }
 0x48d   : > { %v652_v6 = vpop.f32.mrb[12].mxu0 }
 0x48e   : > { %v2176_v7 = vpop.f32.mrb[13].mxu0  ;;  %v658_v39 = vpack.c.bf16 %v652_v6, %v652_v6 }
 0x48f   : > { %v655_v8 = vpop.f32.mrb[14].mxu0 }
 0x490   : > { %v2177_v9 = vpop.f32.mrb[15].mxu0 }
 0x495   : > { %v768_v10 = vpop.f32.mrb[16].mxu0 }
 0x496   : > { %v832_v11 = vpack.c.bf16 %v768_v10, %v768_v10  ;;  %v2192_v12 = vpop.f32.mrb[17].mxu0 }
 0x497   : > { %v771_v13 = vpop.f32.mrb[18].mxu0 }
 0x498   : > { %v837_v15 = vsel %vm549_vm2, %v832_v11, 0  ;;  %v2193_v16 = vpop.f32.mrb[19].mxu0 }
 0x499   : > { %2203 = vmatpush3.bf16.xpose.msra.mxu0 %v837_v15 }
 0x49a   : > { %2214 = vmatprep.subr.bf16.mxu0 %v2501_v4 }
 0x4a0   : > { %2205 = vmatmul.mubr.msk.bf16.vlgmr.msra.gmra.mrb[20].mxu0 %vm549_vm2, %v831_v17 }
 0x4a1   : > { %2216 = vmatprep.mubr.msk.bf16.mxu0 %vm2502_vm1, %v2501_v4  ;;  %2215 = vmatpush3.bf16.msra.mxu0 %v947_v31 }
 0x4a2   : > { %2226 = vmatprep.subr.bf16.mxu0 %v2501_v4 }
 0x573   : > { %v873_v18 = vpop.f32.mrb[20].mxu0 }
 0x574   : > { %v879_v19 = vmul.f32 0.35355338, %v873_v18  ;;  %v2206_v20 = vpop.f32.mrb[21].mxu0 }
 0x575   : > { %v876_v21 = vpop.f32.mrb[22].mxu0 }
 0x576   : > { %v2207_v22 = vpop.f32.mrb[23].mxu0  ;;  %v880_v23 = vadd.f32 %v879_v19, %v2699_v40 }
 0x578   : > { %v881_v24 = vsel %vm549_vm2, %v880_v23, -inf }
 0x579   : > { %882 = vmax.xlane.f32.xlu1 %v881_v24 }
 0x606   : > { %v883_v25 = vpop.xlane.xlu1 %882 }
 0x607   : > { %v884_v26 = vsub.f32 %v880_v23, %v883_v25 }
 0x609   : > { %v885_v27 = vmul.f32 1.442695, %v884_v26 }
 0x60b   : > { %2419 = vpow2.f32 %v885_v27 }
 0x615   : > { %v2420_v28 = vpop.eup %2419 }
 0x616   : > { %v887_v29 = vsel %vm549_vm2, %v2420_v28, 0.0 }
 0x617   : > { %888 = vadd.xlane.f32.xlu0 %v887_v29 }
 0x6a4   : > { %v889_v32 = vpop.xlane.xlu0 %888 }
 0x6a5   : > { %2421 = vrcp.f32 %v889_v32 }
 0x6af   : > { %v2422_v33 = vpop.eup %2421 }
 0x6b0   : > { %v891_v35 = vmul.f32 %v2422_v33, %v2420_v28  ;;  %v2026_v28 = vld [vmem:[%s2964_s7 + $0x8] sm:$0xf]  ;;  %v2397_v33 = vld [vmem:[%s2961_s4 + $0x30] sm:$0xff]  }
 0x6b1   : > { %v1322_v29 = vsel %vm614_vm3, %v2026_v28, 0 }
 0x6b2   : > { %v892_v36 = vpack.c.bf16 %v891_v35, %v891_v35  ;;  %v2398_v35 = vld [vmem:[%s2961_s4 + $0x38] sm:$0xff]  }
 0x6b4   : > { %2211 = vmatmul.mubr.msk.bf16.vlgmr.msra.gmra.mrb[12].mxu1 %vm549_vm2, %v892_v36  ;;  %v2399_v36 = vld [vmem:[%s2963_s6 + $0x30] sm:$0xff]  }
 0x6b5   : > { %2221 = vmatpush3.bf16.msra.mxu1 %v993_v37  ;;  %2222 = vmatprep.mubr.msk.bf16.mxu1 %vm2502_vm1, %v2501_v4  ;;  %v2400_v37 = vld [vmem:[%s2963_s6 + $0x38] sm:$0xff]  }
 0x6b6   : > { %2234 = vmatprep.subr.bf16.mxu1 %v2501_v4 }
 0x6bc   : > { %2223 = vmatmul.mubr.msk.bf16.vlgmr.msra.gmra.mrb[16].mxu1 %vm549_vm2, %v658_v39  ;;  %v2401_v39 = vld [vmem:[%s2962_s5 + $0x30] sm:$0xff]  }
 0x6bd   : > { %2235 = vmatpush3.bf16.msra.mxu1 %v2391_v38  ;;  %2238 = vmatprep.mubr.msk.bf16.mxu1 %vm2502_vm1, %v2501_v4 }
 0x6be   : > { %2236 = vmatprep.subr.bf16.mxu1 %v2501_v4 }
 0x6c1   : > { %2237 = vmatpush3.bf16.msra.mxu1 %v2392_v41 }
 0x6c2   : > { %2250 = vmatprep.subr.bf16.mxu1 %v2501_v4 }
 0x6c4   : > { %2239 = vmatmul.mubr.msk.bf16.vlgmr.msra.gmra.mrb[20].mxu1 %vm358_vm0, %v2638_v14 }
 0x6c5   : > { %2252 = vmatprep.mubr.msk.bf16.mxu1 %vm2502_vm1, %v2501_v4 }
 0x787   : > { %v934_v42 = vpop.f32.mrb[12].mxu1 }
 0x788   : > { %v940_v44 = vpack.c.bf16 %v934_v42, %v934_v42  ;;  %v2212_v45 = vpop.f32.mrb[13].mxu1 }
 0x789   : > { %v937_v46 = vpop.f32.mrb[14].mxu1  ;;  %v2402_v45 = vld [vmem:[%s2962_s5 + $0x38] sm:$0xff]  }
 0x78a   : > { %v2213_v47 = vpop.f32.mrb[15].mxu1  ;;  %2217 = vmatmul.mubr.msk.bf16.vlgmr.msra.gmra.mrb[24].mxu0 %vm549_vm2, %v940_v44 }
 0x78b   : > { %2227 = vmatpush3.bf16.msra.mxu0 %v2393_v43  ;;  %2230 = vmatprep.mubr.msk.bf16.mxu0 %vm2502_vm1, %v2501_v4 }
 0x78c   : > { %2228 = vmatprep.subr.bf16.mxu0 %v2501_v4 }
 0x78f   : > { %v1029_v49 = vpop.f32.mrb[16].mxu1  ;;  %2229 = vmatpush3.bf16.msra.mxu0 %v2394_v48 }
 0x790   : > { %v2224_v51 = vpop.f32.mrb[17].mxu1  ;;  %2242 = vmatprep.subr.bf16.mxu0 %v2501_v4 }
 0x791   : > { %v1032_v52 = vpop.f32.mrb[18].mxu1 }
 0x792   : > { %v2225_v53 = vpop.f32.mrb[19].mxu1  ;;  %2231 = vmatmul.mubr.msk.bf16.vlgmr.msra.gmra.mrb[28].mxu0 %vm358_vm0, %v2638_v14 }
 0x793   : > { %2243 = vmatpush3.bf16.msra.mxu0 %v2395_v50  ;;  %2246 = vmatprep.mubr.msk.bf16.mxu0 %vm2502_vm1, %v2501_v4 }
 0x794   : > { %2244 = vmatprep.subr.bf16.mxu0 %v2501_v4 }
 0x797   : > { %v1143_v55 = vpop.f32.mrb[20].mxu1  ;;  %2245 = vmatpush3.bf16.msra.mxu0 %v2396_v54 }
 0x798   : > { %v1207_v56 = vpack.c.bf16 %v1143_v55, %v1143_v55  ;;  %v2240_v57 = vpop.f32.mrb[21].mxu1  ;;  %2256 = vmatprep.subr.bf16.mxu0 %v2501_v4 }
 0x799   : > { %v1146_v58 = vpop.f32.mrb[22].mxu1 }
 0x79a   : > { %v1212_v59 = vsel %vm549_vm2, %v1207_v56, 0  ;;  %v2241_v60 = vpop.f32.mrb[23].mxu1  ;;  %2247 = vmatmul.mubr.msk.bf16.vlgmr.msra.gmra.mrb[32].mxu0 %vm358_vm0, %v2638_v14 }
 0x79b   : > { %2251 = vmatpush3.bf16.xpose.msra.mxu1 %v1212_v59  ;;  %2258 = vmatprep.mubr.msk.bf16.mxu0 %vm2502_vm1, %v2501_v4 }
 0x79c   : > { %2262 = vmatprep.subr.bf16.mxu1 %v2501_v4 }
 0x85d   : > { %v983_v61 = vpop.f32.mrb[24].mxu0 }
 0x85e   : > { %v2786_v62 = vadd.f32 %v1029_v49, %v983_v61  ;;  %v2218_v63 = vpop.f32.mrb[25].mxu0 }
 0x85f   : > { %v986_v1 = vpop.f32.mrb[26].mxu0 }
 0x860   : > { %v2219_v2 = vpop.f32.mrb[27].mxu0 }
 0x865   : > { %v1086_v3 = vpop.f32.mrb[28].mxu0 }
 0x866   : > { %v1206_v5 = vpack.c.bf16 %v1086_v3, %v1086_v3  ;;  %v2232_v6 = vpop.f32.mrb[29].mxu0 }
 0x867   : > { %v1089_v7 = vpop.f32.mrb[30].mxu0 }
 0x868   : > { %v2233_v8 = vpop.f32.mrb[31].mxu0  ;;  %2253 = vmatmul.mubr.msk.bf16.vlgmr.msra.gmra.mrb[24].mxu1 %vm549_vm2, %v1206_v5 }
 0x869   : > { %2264 = vmatprep.mubr.msk.bf16.mxu1 %vm2502_vm1, %v2501_v4  ;;  %2263 = vmatpush3.bf16.msra.mxu1 %v1322_v29 }
 0x86a   : > { %2276 = vmatprep.subr.bf16.mxu1 %v2501_v4 }
 0x86d   : > { %v1200_v9 = vpop.f32.mrb[32].mxu0 }
 0x86e   : > { %v1268_v10 = vpack.c.bf16 %v1200_v9, %v1200_v9  ;;  %v2248_v11 = vpop.f32.mrb[33].mxu0 }
 0x86f   : > { %v1203_v12 = vpop.f32.mrb[34].mxu0 }
 0x870   : > { %v1273_v13 = vsel %vm614_vm3, %v1268_v10, 0  ;;  %v2249_v15 = vpop.f32.mrb[35].mxu0 }
 0x871   : > { %2257 = vmatpush3.bf16.msra.mxu0 %v1273_v13 }
 0x872   : > { %2268 = vmatprep.subr.bf16.mxu0 %v2501_v4 }
 0x93b   : > { %v1248_v16 = vpop.f32.mrb[24].mxu1 }
 0x93c   : > { %v1254_v17 = vmul.f32 0.35355338, %v1248_v16  ;;  %v2254_v18 = vpop.f32.mrb[25].mxu1 }
 0x93d   : > { %v1251_v19 = vpop.f32.mrb[26].mxu1  ;;  %v2051_v18 = vld [vmem:[%s2964_s7 + $0xc] sm:$0xf] }
 0x93e   : > { %v2255_v20 = vpop.f32.mrb[27].mxu1  ;;  %v1255_v21 = vadd.f32 %v1254_v17, %v2699_v40  ;;  %v1652_v19 = vsel %vm614_vm3, %v2051_v18, 0 }
 0x940   : > { %v1256_v22 = vsel %vm549_vm2, %v1255_v21, -inf }
 0x941   : > { %1257 = vmax.xlane.f32.xlu1 %v1256_v22 }
 0x9ce   : > { %v1258_v23 = vpop.xlane.xlu1 %1257 }
 0x9cf   : > { %v1259_v24 = vsub.f32 %v1255_v21, %v1258_v23 }
 0x9d1   : > { %v1260_v25 = vmul.f32 1.442695, %v1259_v24 }
 0x9d3   : > { %2423 = vpow2.f32 %v1260_v25 }
 0x9dd   : > { %v2424_v26 = vpop.eup %2423 }
 0x9de   : > { %v1262_v27 = vsel %vm549_vm2, %v2424_v26, 0.0 }
 0x9df   : > { %1263 = vadd.xlane.f32.xlu0 %v1262_v27 }
 0xa6c   : > { %v1264_v30 = vpop.xlane.xlu0 %1263 }
 0xa6d   : > { %2425 = vrcp.f32 %v1264_v30 }
 0xa77   : > { %v2426_v31 = vpop.eup %2425 }
 0xa78   : > { %v1266_v32 = vmul.f32 %v2426_v31, %v2424_v26 }
 0xa7a   : > { %v1267_v34 = vpack.c.bf16 %v1266_v32, %v1266_v32 }
 0xa7c   : > { %2259 = vmatmul.mubr.msk.bf16.vlgmr.msra.gmra.mrb[36].mxu0 %vm549_vm2, %v1267_v34 }
 0xa7d   : > { %2269 = vmatpush3.bf16.msra.mxu0 %v2397_v33  ;;  %2272 = vmatprep.mubr.msk.bf16.mxu0 %vm2502_vm1, %v2501_v4 }
 0xa7e   : > { %2270 = vmatprep.subr.bf16.mxu0 %v2501_v4 }
 0xa81   : > { %2271 = vmatpush3.bf16.msra.mxu0 %v2398_v35 }
 0xa82   : > { %2284 = vmatprep.subr.bf16.mxu0 %v2501_v4 }
 0xa84   : > { %2273 = vmatmul.mubr.msk.bf16.vlgmr.msra.gmra.mrb[40].mxu0 %vm358_vm0, %v2638_v14 }
 0xa85   : > { %2285 = vmatpush3.bf16.msra.mxu0 %v2399_v36  ;;  %2288 = vmatprep.mubr.msk.bf16.mxu0 %vm2502_vm1, %v2501_v4  ;;  %v2403_v36 = vld [vmem:[%s2965_s8] sm:$0xff]  }
 0xa86   : > { %2286 = vmatprep.subr.bf16.mxu0 %v2501_v4 }
 0xa89   : > { %2287 = vmatpush3.bf16.msra.mxu0 %v2400_v37  ;;  %v2404_v37 = vld [vmem:[%s2965_s8 + $0x8] sm:$0xff]  }
 0xa8a   : > { %2298 = vmatprep.subr.bf16.mxu0 %v2501_v4 }
 0xa8c   : > { %2289 = vmatmul.mubr.msk.bf16.vlgmr.msra.gmra.mrb[44].mxu0 %vm358_vm0, %v2638_v14 }
 0xa8d   : > { %2300 = vmatprep.mubr.msk.bf16.mxu0 %vm2502_vm1, %v2501_v4 }
 0xb4f   : > { %v1309_v38 = vpop.f32.mrb[36].mxu0 }
 0xb50   : > { %v1315_v41 = vpack.c.bf16 %v1309_v38, %v1309_v38  ;;  %v2260_v42 = vpop.f32.mrb[37].mxu0 }
 0xb51   : > { %v1312_v43 = vpop.f32.mrb[38].mxu0  ;;  %v2053_v42 = vld [vmem:[%s2960_s3] ss:$0 sm:$0xff] }
 0xb52   : > { %v2261_v44 = vpop.f32.mrb[39].mxu0  ;;  %2265 = vmatmul.mubr.msk.bf16.vlgmr.msra.gmra.mrb[28].mxu1 %vm549_vm2, %v1315_v41 }
 0xb53   : > { %2277 = vmatpush3.bf16.msra.mxu1 %v2401_v39  ;;  %2280 = vmatprep.mubr.msk.bf16.mxu1 %vm2502_vm1, %v2501_v4 }
 0xb54   : > { %2278 = vmatprep.subr.bf16.mxu1 %v2501_v4 }
 0xb57   : > { %v1416_v46 = vpop.f32.mrb[40].mxu0  ;;  %2279 = vmatpush3.bf16.msra.mxu1 %v2402_v45 }
 0xb58   : > { %v2274_v47 = vpop.f32.mrb[41].mxu0  ;;  %2292 = vmatprep.subr.bf16.mxu1 %v2501_v4  ;;  %v1536_v5 = vpack.c.bf16 %v1416_v46, %v1416_v46  ;;  %v2405_v46 = vld [vmem:[%s2966_s9] sm:$0xff]  }
 0xb59   : > { %v1419_v48 = vpop.f32.mrb[42].mxu0  ;;  %v2406_v47 = vld [vmem:[%s2966_s9 + $0x8] sm:$0xff]  }
 0xb5a   : > { %v2275_v49 = vpop.f32.mrb[43].mxu0  ;;  %2281 = vmatmul.mubr.msk.bf16.vlgmr.msra.gmra.mrb[32].mxu1 %vm358_vm0, %v2638_v14  ;;  %v2407_v48 = vld [vmem:[%s2966_s9 + $0x10] sm:$0xff]  }
 0xb5b   : > { %2294 = vmatprep.mubr.msk.bf16.mxu1 %vm2502_vm1, %v2501_v4  ;;  %v2408_v49 = vld [vmem:[%s2966_s9 + $0x18] sm:$0xff]  }
 0xb5f   : > { %v1530_v50 = vpop.f32.mrb[44].mxu0 }
 0xb60   : > { %v1598_v51 = vpack.c.bf16 %v1530_v50, %v1530_v50  ;;  %v2290_v52 = vpop.f32.mrb[45].mxu0  ;;  %v2409_v50 = vld [vmem:[%s2966_s9 + $0x20] sm:$0xff]  }
 0xb61   : > { %v1533_v53 = vpop.f32.mrb[46].mxu0  ;;  %v2411_v52 = vld [vmem:[%s2966_s9 + $0x30] sm:$0xff]  }
 0xb62   : > { %v1603_v54 = vsel %vm614_vm3, %v1598_v51, 0  ;;  %v2291_v55 = vpop.f32.mrb[47].mxu0  ;;  %v2410_v51 = vld [vmem:[%s2966_s9 + $0x28] sm:$0xff]   ;;  %v2412_v53 = vld [vmem:[%s2966_s9 + $0x38] sm:$0xff]  }
 0xb63   : > { %2299 = vmatpush3.bf16.msra.mxu0 %v1603_v54 }
 0xb64   : > { %2310 = vmatprep.subr.bf16.mxu0 %v2501_v4 }
 0xc25   : > { %v1358_v56 = vpop.f32.mrb[28].mxu1 }
 0xc26   : > { %v1364_v57 = vadd.f32 %v1358_v56, %v2786_v62  ;;  %v2266_v58 = vpop.f32.mrb[29].mxu1 }
 0xc27   : > { %v1361_v59 = vpop.f32.mrb[30].mxu1 }
 0xc28   : > { %v2267_v60 = vpop.f32.mrb[31].mxu1 }
 0xc2d   : > { %v1473_v14 = vpop.f32.mrb[32].mxu1 }
 0xc2e   : > { %v1537_v61 = vpack.c.bf16 %v1473_v14, %v1473_v14  ;;  %v2282_v63 = vpop.f32.mrb[33].mxu1 }
 0xc2f   : > { %v1476_v1 = vpop.f32.mrb[34].mxu1 }
 0xc30   : > { %v1542_v2 = vsel %vm549_vm2, %v1537_v61, 0  ;;  %v2283_v3 = vpop.f32.mrb[35].mxu1 }
 0xc31   : > { %2293 = vmatpush3.bf16.xpose.msra.mxu1 %v1542_v2 }
 0xc32   : > { %2304 = vmatprep.subr.bf16.mxu1 %v2501_v4 }
 0xc38   : > { %2295 = vmatmul.mubr.msk.bf16.vlgmr.msra.gmra.mrb[36].mxu1 %vm549_vm2, %v1536_v5 }
 0xc39   : > { %2306 = vmatprep.mubr.msk.bf16.mxu1 %vm2502_vm1, %v2501_v4  ;;  %2305 = vmatpush3.bf16.msra.mxu1 %v1652_v19 }
 0xc3a   : > { %2318 = vmatprep.subr.bf16.mxu1 %v2501_v4 }
 0xd0b   : > { %v1578_v62 = vpop.f32.mrb[36].mxu1 }
 0xd0c   : > { %v1584_v6 = vmul.f32 0.35355338, %v1578_v62  ;;  %v2296_v7 = vpop.f32.mrb[37].mxu1 }
 0xd0d   : > { %v1581_v8 = vpop.f32.mrb[38].mxu1 }
 0xd0e   : > { %v2297_v9 = vpop.f32.mrb[39].mxu1  ;;  %v1585_v10 = vadd.f32 %v1584_v6, %v2699_v40 }
 0xd10   : > { %v1586_v11 = vsel %vm549_vm2, %v1585_v10, -inf }
 0xd11   : > { %1587 = vmax.xlane.f32.xlu1 %v1586_v11 }
 0xd9e   : > { %v1588_v12 = vpop.xlane.xlu1 %1587 }
 0xd9f   : > { %v1589_v13 = vsub.f32 %v1585_v10, %v1588_v12 }
 0xda1   : > { %v1590_v15 = vmul.f32 1.442695, %v1589_v13 }
 0xda3   : > { %2427 = vpow2.f32 %v1590_v15 }
 0xdad   : > { %v2428_v16 = vpop.eup %2427 }
 0xdae   : > { %v1592_v17 = vsel %vm549_vm2, %v2428_v16, 0.0 }
 0xdaf   : > { %1593 = vadd.xlane.f32.xlu0 %v1592_v17 }
 0xe3c   : > { %v1594_v40 = vpop.xlane.xlu0 %1593 }
 0xe3d   : > { %2429 = vrcp.f32 %v1594_v40 }
 0xe47   : > { %v2430_v20 = vpop.eup %2429 }
 0xe48   : > { %v1596_v21 = vmul.f32 %v2430_v20, %v2428_v16 }
 0xe4a   : > { %v1597_v22 = vpack.c.bf16 %v1596_v21, %v1596_v21 }
 0xe4c   : > { %2301 = vmatmul.mubr.msk.bf16.vlgmr.msra.gmra.mrb[48].mxu0 %vm549_vm2, %v1597_v22 }
 0xe4d   : > { %2314 = vmatprep.mubr.msk.bf16.mxu0 %vm2502_vm1, %v2501_v4  ;;  %2311 = vmatpush3.bf16.msra.mxu0 %v2403_v36 }
 0xe4e   : > { %2312 = vmatprep.subr.bf16.mxu0 %v2501_v4 }
 0xe51   : > { %2313 = vmatpush3.bf16.msra.mxu0 %v2404_v37 }
 0xf1f   : > { %v1639_v23 = vpop.f32.mrb[48].mxu0 }
 0xf20   : > { %v1645_v24 = vpack.c.bf16 %v1639_v23, %v1639_v23  ;;  %v2302_v25 = vpop.f32.mrb[49].mxu0 }
 0xf21   : > { %v1642_v26 = vpop.f32.mrb[50].mxu0 }
 0xf22   : > { %v2303_v27 = vpop.f32.mrb[51].mxu0  ;;  %2307 = vmatmul.mubr.msk.bf16.vlgmr.msra.gmra.mrb[40].mxu1 %vm549_vm2, %v1645_v24 }
 0xf23   : > { %2334 = vmatprep.mubr.msk.bf16.mxu1 %vm2502_vm1, %v2501_v4  ;;  %2319 = vmatpush3.bf16.msra.mxu1 %v2405_v46 }
 0xf24   : > { %2320 = vmatprep.subr.bf16.mxu1 %v2501_v4 }
 0xf27   : > { %2321 = vmatpush3.bf16.msra.mxu1 %v2406_v47 }
 0xf28   : > { %2322 = vmatprep.subr.bf16.mxu1 %v2501_v4 }
 0xf2b   : > { %2323 = vmatpush3.bf16.msra.mxu1 %v2407_v48 }
 0xf2c   : > { %2324 = vmatprep.subr.bf16.mxu1 %v2501_v4 }
 0xf2f   : > { %2325 = vmatpush3.bf16.msra.mxu1 %v2408_v49 }
 0xf30   : > { %2326 = vmatprep.subr.bf16.mxu1 %v2501_v4 }
 0xf33   : > { %2327 = vmatpush3.bf16.msra.mxu1 %v2409_v50 }
 0xf34   : > { %2328 = vmatprep.subr.bf16.mxu1 %v2501_v4 }
 0xf37   : > { %2329 = vmatpush3.bf16.msra.mxu1 %v2410_v51 }
 0xf38   : > { %2330 = vmatprep.subr.bf16.mxu1 %v2501_v4 }
 0xf3b   : > { %2331 = vmatpush3.bf16.msra.mxu1 %v2411_v52 }
 0xf3c   : > { %2332 = vmatprep.subr.bf16.mxu1 %v2501_v4 }
 0xf3f   : > { %2333 = vmatpush3.bf16.msra.mxu1 %v2412_v53 }
 0xff5   : > { %v1688_v28 = vpop.f32.mrb[40].mxu1 }
 0xff6   : > { %v1694_v29 = vadd.f32 %v1688_v28, %v1364_v57  ;;  %v2308_v30 = vpop.f32.mrb[41].mxu1 }
 0xff7   : > { %v1691_v31 = vpop.f32.mrb[42].mxu1 }
 0xff8   : > { %v1695_v32 = vadd.f32 %v1694_v29, %v2612_v0  ;;  %v2309_v33 = vpop.f32.mrb[43].mxu1 }
 0xffa   : > { %v1696_v34 = vmul.f32 %v1695_v32, %v1695_v32 }
 0xffc   : > { %v1697_v35 = vsel %vm358_vm0, %v1696_v34, 0.0 }
 0xffd   : > { %1698 = vadd.xlane.f32.xlu1 %v1697_v35 }
0x108a   : > { %v1699_v38 = vpop.xlane.xlu1 %1698 }
0x108b   : > { %v1700_v39 = vmul.f32 0.03125, %v1699_v38 }
0x108d   : > { %v1701_v0 = vadd.f32 1e-05, %v1700_v39 }
0x108f   : > { %2431 = vrsqrt.f32 %v1701_v0 }
0x1099   : > { %v2432_v41 = vpop.eup %2431 }
0x109a   : > { %v1703_v43 = vmul.f32 %v2432_v41, %v1695_v32 }
0x109c   : > { %v1711_v44 = vmul.f32 %v2053_v42, %v1703_v43 }
0x109e   : > { %v1712_v45 = vpack.c.bf16 %v1711_v44, %v1711_v44 }
0x10a0   : > { %2315 = vmatmul.mubr.msk.bf16.vlgmr.msra.gmra.mrb[52].mxu0 %vm358_vm0, %v1712_v45 }
0x1173   : > { %v1766_v54 = vpop.f32.mrb[52].mxu0 }
0x1174   : > { %v2057_v55 = vmul.f32 -1.442695, %v1766_v54  ;;  %v2316_v56 = vpop.f32.mrb[53].mxu0 }
0x1175   : > { %v1769_v57 = vpop.f32.mrb[54].mxu0 }
0x1176   : > { %2433 = vpow2.f32 %v2057_v55  ;;  %v2317_v58 = vpop.f32.mrb[55].mxu0 }
0x1180   : > { %v2434_v59 = vpop.eup %2433 }
0x1181   : > { %v1775_v60 = vadd.f32 1.0, %v2434_v59 }
0x1183   : > { %2435 = vrcp.f32 %v1775_v60 }
0x118d   : > { %v2436_v14 = vpop.eup %2435 }
0x118e   : > { %v1778_v61 = vmul.f32 %v2436_v14, %v1766_v54 }
0x1190   : > { %v1779_v63 = vpack.c.bf16 %v1778_v61, %v1778_v61 }
0x1192   : > { %2335 = vmatmul.mubr.bf16.vlgmr.msra.gmra.mrb[44].mxu1 %v1779_v63 }
0x1265   : > { %v1878_v4 = vpop.f32.mrb[44].mxu1 }
0x1266   : > { %v1884_v1 = vadd.f32 %v1878_v4, %v1695_v32  ;;  %v2336_v2 = vpop.f32.mrb[45].mxu1 }
0x1267   : > { %v1881_v3 = vpop.f32.mrb[46].mxu1 }
0x1268   : > { %v2337_v5 = vpop.f32.mrb[47].mxu1  ;;  %1885 = vst.msk [vmem:[%s350_s27] sm:$0xff] %vm358_vm0, %v1884_v1 }
0x1269   : > { %2450 = shalt.err (!%p2447_p3)
}
0x126a   : > { %s2451_s21 = scalar_lea.hbm %s2914_s11, 128  ;;  %s2455_s29 = scalar_lea.hbm %s2967_s10, 256 }
0x126b   : > { %p2452_p4 = scmp.ne.s32.totalorder %s2914_s11, %s2451_s21  ;;  %p2456_p9 = scmp.lt.u32.totalorder %s2914_s11, %s2967_s10 }
0x126c   : > { %p2457_p10 = scmp.lt.u32.totalorder %s2455_s29, %s2451_s21  ;;  %p2459_p12 = scmp.lt.u32.totalorder %s2451_s21, %s2914_s11 }
0x126d   : > { %p2453_p7 = pnand %p2452_p4, %p2597_p5 }
0x126e   : > { %p2458_p11 = por %p2457_p10, %p2456_p9 }
0x126f   : > { %p2454_p8 = pneg %p2453_p7 }
0x1270   : > { %p2460_p13 = por %p2459_p12, %p2458_p11 }
0x1272   : > { %p2461_p0 = pnand %p2460_p13, %p2454_p8 }
0x1274   : > { %2464 = shalt.err (!%p2461_p0)
}
0x1275   : > { %2338 = dma.vmem_to_hbm [thread:$0]  (%p2597_p5), %s2916_s28, 128, %s2914_s11, %s1887_s17  }
0x1276 PF: > { %p2344_p1 = scmp.ge.s32.totalorder %s2499_s16, 2  ;;  %s1912_s12 = sand.u32 1, %s2487_s13  }
0x1277   : > { %s1913_s20 = scalar_lea.sflag [#allocation3], %s1912_s12 }
0x1278   : > { %p2341_p2 = pnand %p2344_p1, %p2601_p6 }
0x127a   : > { %2482 = dma.done.wait (!%p2341_p2), %s1913_s20, 128  }
0x127b   : > { %2484 = vsyncadd (!%p2341_p2), %s1913_s20, 4294967168  ;;  %p20_p3 = scmp.ge.s32.totalorder %s2584_s19, 4   ;;  %s2970_s13 = smov %s2491_s14 }
0x127c   : > { %s2971_s14 = smov %s2495_s15  ;;  %s2972_s15 = smov %s2595_s22 }
0x127d   : > { %s2973_s16 = smov %s2584_s19  ;;  %22 = sbr.rel (!%p20_p3) target bundleno = 3 (0x3), region = 107 }
0x1284   :  { %1918 = vsyncpa [#allocation3], 1 }
0x1285   :  { %1920 = vsyncpa [#allocation3 + $0x1], 1 }

</bundles_post_ra>
